<compile_context>
chip_gen: v6e
topology: v6e:2x2x1
jax: 0.10.0
libtpu: 0.0.40
codegen_flags: <defaults>
</compile_context>

<pallas_src>
import functools

import jax
import jax.numpy as jnp
from jax.experimental import pallas as pl
from jax.experimental.pallas import tpu as pltpu


ACTIVATION = jnp.tanh  # stand-in for determine_activation(activation_name)

_LANE = 128     # lane width (last-dim tiling)
_SUBLANE = 8    # sublane width (second-to-last-dim tiling)


def _round_up(v, m):
    return ((v + m - 1) // m) * m


def _mlp_kernel(x_ref, w_in_ref, w_hid_ref, w_out_ref, o_ref, *, n_hidden_layers):
    # One batch tile per grid step; weights are VMEM-resident across steps.
    h = ACTIVATION(
        jnp.dot(x_ref[...], w_in_ref[...], preferred_element_type=jnp.float32)
    )
    # Static Python loop over hidden layers (small, fixed trip count) — static
    # indexing into w_hid_ref avoids dynamic VMEM slicing per iteration.
    for layer in range(n_hidden_layers):
        w = w_hid_ref[layer]
        h = ACTIVATION(jnp.dot(h, w, preferred_element_type=jnp.float32))
    o_ref[...] = jnp.dot(
        h, w_out_ref[...], preferred_element_type=jnp.float32
    ).astype(o_ref.dtype)


def mlp_forward(x, w_in, w_hid, w_out, *, block_batch=512):
    """x: [B, n_input]; w_in: [n_input, n_neurons];
    w_hid: [n_hidden_layers, n_neurons, n_neurons]; w_out: [n_neurons, n_output]
    (weights stored pre-transposed, i.e. [in, out]).
    Returns y[:, :3] like the PyTorch module."""
    batch, n_input = x.shape
    n_hidden_layers = w_hid.shape[0]
    n_neurons = w_in.shape[1]
    n_out_keep = 3  # forward() returns x[:, :3]
    assert w_out.shape[1] >= n_out_keep, "n_output must be >= 3"

    # Pad feature dims to the 128-wide lane axis; zero padding is exact here
    # because tanh(0) == 0 and padded weight rows/cols are zero.
    in_p = _round_up(n_input, _LANE)
    hid_p = _round_up(n_neurons, _LANE)
    out_p = _LANE  # lane-dense output slab; only the first 3 columns are real

    # Batch tile: multiple of the sublane width; cap at block_batch rows.
    tb = min(block_batch, _round_up(batch, _SUBLANE))
    batch_p = _round_up(batch, tb)
    n_tiles = batch_p // tb

    f32 = jnp.float32
    x_p = jnp.zeros((batch_p, in_p), f32).at[:batch, :n_input].set(
        x.astype(f32)
    )
    w_in_p = jnp.zeros((in_p, hid_p), f32).at[:n_input, :n_neurons].set(
        w_in.astype(f32)
    )
    w_hid_p = (
        jnp.zeros((n_hidden_layers, hid_p, hid_p), f32)
        .at[:, :n_neurons, :n_neurons]
        .set(w_hid.astype(f32))
    )
    # Pre-slice w_out to the 3 columns the module returns, then lane-pad.
    w_out_p = jnp.zeros((hid_p, out_p), f32).at[:n_neurons, :n_out_keep].set(
        w_out[:, :n_out_keep].astype(f32)
    )

    kernel = functools.partial(_mlp_kernel, n_hidden_layers=n_hidden_layers)

    y_p = pl.pallas_call(
        kernel,
        out_shape=jax.ShapeDtypeStruct((batch_p, out_p), jnp.float32),
        grid_spec=pltpu.PrefetchScalarGridSpec(
            num_scalar_prefetch=0,
            grid=(n_tiles,),
            in_specs=[
                # x tiles stream over the batch axis.
                pl.BlockSpec((tb, in_p), lambda i: (i, 0)),
                # Weights: constant index_map -> DMA'd once, VMEM-resident.
                pl.BlockSpec((in_p, hid_p), lambda i: (0, 0)),
                pl.BlockSpec((n_hidden_layers, hid_p, hid_p), lambda i: (0, 0, 0)),
                pl.BlockSpec((hid_p, out_p), lambda i: (0, 0)),
            ],
            out_specs=pl.BlockSpec((tb, out_p), lambda i: (i, 0)),
        ),
        compiler_params=pltpu.CompilerParams(
            # Independent batch tiles: shard across TCs on v7x megacore.
            dimension_semantics=("parallel",),
        ),
    )(x_p, w_in_p, w_hid_p, w_out_p)

    # Strip batch padding and the lane padding of the 3 real output columns.
    return y_p[:batch, :n_out_keep]


def _reference(x, w_in, w_hid, w_out):
    h = ACTIVATION(x @ w_in)
    for layer in range(w_hid.shape[0]):
        h = ACTIVATION(h @ w_hid[layer])
    y = h @ w_out
    return y[:, :3]


if __name__ == "__main__":
    # Small shapes consistent with the module's constructor arguments.
    batch = 8
    n_input = 16
    n_neurons = 32
    n_hidden_layers = 2
    n_output = 4  # must be >= 3 since forward returns x[:, :3]

    key = jax.random.PRNGKey(0)
    kx, k_in, k_hid, k_out = jax.random.split(key, 4)

    x = jax.random.normal(kx, (batch, n_input), dtype=jnp.float32)
    # Deterministic parameter init (weights stored pre-transposed: [in, out]).
    w_in = 0.1 * jax.random.normal(k_in, (n_input, n_neurons), dtype=jnp.float32)
    w_hid = 0.1 * jax.random.normal(
        k_hid, (n_hidden_layers, n_neurons, n_neurons), dtype=jnp.float32
    )
    w_out = 0.1 * jax.random.normal(k_out, (n_neurons, n_output), dtype=jnp.float32)

    y = mlp_forward(x, w_in, w_hid, w_out)
    jax.block_until_ready(y)

    y_ref = _reference(x, w_in, w_hid, w_out)
    assert y.shape == (batch, 3), y.shape
    assert jnp.allclose(y, y_ref, atol=1e-5, rtol=1e-5), "mismatch vs reference"

    print("KERNEL_OK")
</pallas_src>

<mosaic_0001>
module attributes {stable_mosaic.version = 11 : i64} {
  func.func @_mlp_kernel(%arg0: i32, %arg1: memref<8x128xf32, #tpu.memory_space<vmem>>, %arg2: memref<128x128xf32, #tpu.memory_space<vmem>>, %arg3: memref<2x128x128xf32, #tpu.memory_space<vmem>>, %arg4: memref<128x128xf32, #tpu.memory_space<vmem>>, %arg5: memref<8x128xf32, #tpu.memory_space<vmem>>) attributes {dimension_semantics = [#tpu.dimension_semantics<parallel>], iteration_bounds = array<i64: 1>, scalar_prefetch = 0 : i64, scratch_operands = 0 : i64, tpu.core_type = #tpu.core_type<tc>, window_params = [{transform_indices = @transform_0, window_bounds = array<i64: 8, 128>}, {pipeline_mode = #tpu.pipeline_mode<synchronous>, transform_indices = @transform_1, window_bounds = array<i64: 128, 128>}, {pipeline_mode = #tpu.pipeline_mode<synchronous>, transform_indices = @transform_2, window_bounds = array<i64: 2, 128, 128>}, {pipeline_mode = #tpu.pipeline_mode<synchronous>, transform_indices = @transform_3, window_bounds = array<i64: 128, 128>}, {transform_indices = @transform_4, window_bounds = array<i64: 8, 128>}]} {
    %c0 = arith.constant 0 : index
    %c0_0 = arith.constant 0 : index
    %0 = vector.load %arg1[%c0, %c0_0] : memref<8x128xf32, #tpu.memory_space<vmem>>, vector<8x128xf32>
    %c0_1 = arith.constant 0 : index
    %c0_2 = arith.constant 0 : index
    %1 = vector.load %arg2[%c0_1, %c0_2] : memref<128x128xf32, #tpu.memory_space<vmem>>, vector<128x128xf32>
    %cst = arith.constant dense<0.000000e+00> : vector<8x128xf32>
    %2 = tpu.matmul %0, %1, %cst {dimension_numbers = #tpu.dot_dimension_numbers<[1], [0], [0], [1], [0, 0, 1, 1], [], []>} : vector<8x128xf32>, vector<128x128xf32>, vector<8x128xf32> -> vector<8x128xf32>
    %3 = math.tanh %2 : vector<8x128xf32>
    %c0_3 = arith.constant 0 : index
    %c0_4 = arith.constant 0 : index
    %c0_5 = arith.constant 0 : index
    %4 = vector.load %arg3[%c0_3, %c0_4, %c0_5] : memref<2x128x128xf32, #tpu.memory_space<vmem>>, vector<1x128x128xf32>
    %5 = vector.shape_cast %4 : vector<1x128x128xf32> to vector<128x128xf32>
    %cst_6 = arith.constant dense<0.000000e+00> : vector<8x128xf32>
    %6 = tpu.matmul %3, %5, %cst_6 {dimension_numbers = #tpu.dot_dimension_numbers<[1], [0], [0], [1], [0, 0, 1, 1], [], []>} : vector<8x128xf32>, vector<128x128xf32>, vector<8x128xf32> -> vector<8x128xf32>
    %7 = math.tanh %6 : vector<8x128xf32>
    %c1 = arith.constant 1 : index
    %c0_7 = arith.constant 0 : index
    %c0_8 = arith.constant 0 : index
    %8 = vector.load %arg3[%c1, %c0_7, %c0_8] : memref<2x128x128xf32, #tpu.memory_space<vmem>>, vector<1x128x128xf32>
    %9 = vector.shape_cast %8 : vector<1x128x128xf32> to vector<128x128xf32>
    %cst_9 = arith.constant dense<0.000000e+00> : vector<8x128xf32>
    %10 = tpu.matmul %7, %9, %cst_9 {dimension_numbers = #tpu.dot_dimension_numbers<[1], [0], [0], [1], [0, 0, 1, 1], [], []>} : vector<8x128xf32>, vector<128x128xf32>, vector<8x128xf32> -> vector<8x128xf32>
    %11 = math.tanh %10 : vector<8x128xf32>
    %c0_10 = arith.constant 0 : index
    %c0_11 = arith.constant 0 : index
    %12 = vector.load %arg4[%c0_10, %c0_11] : memref<128x128xf32, #tpu.memory_space<vmem>>, vector<128x128xf32>
    %cst_12 = arith.constant dense<0.000000e+00> : vector<8x128xf32>
    %13 = tpu.matmul %11, %12, %cst_12 {dimension_numbers = #tpu.dot_dimension_numbers<[1], [0], [0], [1], [0, 0, 1, 1], [], []>} : vector<8x128xf32>, vector<128x128xf32>, vector<8x128xf32> -> vector<8x128xf32>
    %c0_13 = arith.constant 0 : index
    %c0_14 = arith.constant 0 : index
    %14 = vector.load %arg5[%c0_13, %c0_14] : memref<8x128xf32, #tpu.memory_space<vmem>>, vector<8x128xf32>
    tpu.vector_store %arg5[%c0_13, %c0_14], %13 {strides = array<i32>} : memref<8x128xf32, #tpu.memory_space<vmem>>, vector<8x128xf32>,
    return
  }
  func.func @transform_0(%arg0: i32) -> (i32, i32) {
    %c0_i32 = arith.constant 0 : i32
    %c0_i32_0 = arith.constant 0 : i32
    return %arg0, %c0_i32 : i32, i32
  }
  func.func @transform_1(%arg0: i32) -> (i32, i32) {
    %c0_i32 = arith.constant 0 : i32
    %c0_i32_0 = arith.constant 0 : i32
    %c0_i32_1 = arith.constant 0 : i32
    return %c0_i32, %c0_i32_0 : i32, i32
  }
  func.func @transform_2(%arg0: i32) -> (i32, i32, i32) {
    %c0_i32 = arith.constant 0 : i32
    %c0_i32_0 = arith.constant 0 : i32
    %c0_i32_1 = arith.constant 0 : i32
    %c0_i32_2 = arith.constant 0 : i32
    return %c0_i32, %c0_i32_0, %c0_i32_1 : i32, i32, i32
  }
  func.func @transform_3(%arg0: i32) -> (i32, i32) {
    %c0_i32 = arith.constant 0 : i32
    %c0_i32_0 = arith.constant 0 : i32
    %c0_i32_1 = arith.constant 0 : i32
    return %c0_i32, %c0_i32_0 : i32, i32
  }
  func.func @transform_4(%arg0: i32) -> (i32, i32) {
    %c0_i32 = arith.constant 0 : i32
    %c0_i32_0 = arith.constant 0 : i32
    return %arg0, %c0_i32 : i32, i32
  }
}

</mosaic_0001>

<bundles_post_ra>
// kernel: tpu_custom_call.1
= control target key start
LH: loop header
LB: loop body
LE: loop exit
PB: predicated region body
PF: predicated region fallthrough
CT: control target
= control target key end

     0   :  { %9 = vsyncpa [#allocation3], 0  ;;  %s899_s0 = inlined_call_operand.hbm [shape: f32[8,128], index: 0, kind: input, shape index: {}]   ;;  %s900_s1 = inlined_call_operand.hbm [shape: f32[128,128], index: 1, kind: input, shape index: {}]   ;;  %s901_s2 = inlined_call_operand.hbm [shape: f32[2,128,128], index: 2, kind: input, shape index: {}]   ;;  %s902_s3 = inlined_call_operand.hbm [shape: f32[128,128], index: 3, kind: input, shape index: {}]   ;;  %s903_s4 = inlined_call_operand.hbm [shape: f32[8,128], index: 4, kind: output, shape index: {}]  }
   0x1   :  { %10 = vsyncpa [#allocation6], 0 }
   0x2   :  { %11 = vsyncpa [#allocation9], 0 }
   0x3   :  { %12 = vsyncpa [#allocation4], 0  ;;  %s769_s15 = smov [#allocation5]  }
   0x4   :  { %s28_s16 = sshll.u32 %s769_s15, 4  ;;  %s29_s16 = int_to_ptr.vmem [resolvable:$true] %s28_s16 }
   0x5   :  { %s669_s17 = scalar_lea.vmem %s29_s16, 2048  ;;  %p674_p1 = scmp.lt.s32.totalorder %s29_s16, %s29_s16 }
   0x6   :  { %p670_p0 = scmp.ne.s32.totalorder %s29_s16, %s669_s17  ;;  %p675_p2 = scmp.lt.s32.totalorder %s669_s17, %s669_s17 }
   0x8   :  { %p676_p3 = por %p675_p2, %p674_p1 }
   0xa   :  { %p677_p4 = pnand %p676_p3, %p670_p0 }
   0xc   :  { %680 = shalt.err (!%p677_p4)
}
   0xd   :  { %s770_s18 = smov 128   ;;  %s771_s19 = smov 8  }
   0xe   :  { %34 = dma.hbm_to_vmem [thread:$0]  %s900_s1, 2048, %s29_s16, [#allocation6], %s770_s18, %s770_s18, %s771_s19  }
   0xf   :  { %s772_s22 = smov [#allocation2]   ;;  %s773_s24 = smov [#allocation7]  }
  0x10   :  { %s19_s23 = sshll.u32 %s772_s22, 4  ;;  %s40_s25 = sshll.u32 %s773_s24, 4  ;;  %s20_s23 = int_to_ptr.vmem [resolvable:$true] %s19_s23  ;;  %s41_s25 = int_to_ptr.vmem [resolvable:$true] %s40_s25 }
  0x11   :  { %s689_s26 = scalar_lea.vmem %s20_s23, 128  ;;  %p694_p6 = scmp.lt.s32.totalorder %s20_s23, %s20_s23 }
  0x12   :  { %p690_p5 = scmp.ne.s32.totalorder %s20_s23, %s689_s26  ;;  %p695_p7 = scmp.lt.s32.totalorder %s689_s26, %s689_s26 }
  0x14   :  { %p696_p8 = por %p695_p7, %p694_p6 }
  0x16   :  { %p697_p9 = pnand %p696_p8, %p690_p5 }
  0x18   :  { %700 = shalt.err (!%p697_p9)
}
  0x19   :  { %22 = dma.hbm_to_vmem [thread:$0]  %s899_s0, 128, %s20_s23, [#allocation3]  }
  0x1a   :  { %s709_s29 = scalar_lea.vmem %s41_s25, 4096  ;;  %p714_p11 = scmp.lt.s32.totalorder %s41_s25, %s41_s25 }
  0x1b   :  { %p710_p10 = scmp.ne.s32.totalorder %s41_s25, %s709_s29  ;;  %p715_p12 = scmp.lt.s32.totalorder %s709_s29, %s709_s29 }
  0x1d   :  { %p716_p13 = por %p715_p12, %p714_p11 }
  0x1f   :  { %p717_p0 = pnand %p716_p13, %p710_p10 }
  0x21   :  { %720 = shalt.err (!%p717_p0)
}
  0x22   :  { %46 = dma.hbm_to_vmem [thread:$0]  %s901_s2, 4096, %s41_s25, [#allocation6], %s770_s18, %s770_s18, %s771_s19  }
  0x23   :  { %s774_s5 = smov [#allocation8]  }
  0x24   :  { %s52_s6 = sshll.u32 %s774_s5, 4  ;;  %s53_s6 = int_to_ptr.vmem [resolvable:$true] %s52_s6 }
  0x25   :  { %s729_s7 = scalar_lea.vmem %s53_s6, 2048  ;;  %p734_p2 = scmp.lt.s32.totalorder %s53_s6, %s53_s6 }
  0x26   :  { %p730_p1 = scmp.ne.s32.totalorder %s53_s6, %s729_s7  ;;  %p735_p3 = scmp.lt.s32.totalorder %s729_s7, %s729_s7 }
  0x28   :  { %p736_p4 = por %p735_p3, %p734_p2 }
  0x2a   :  { %p737_p5 = pnand %p736_p4, %p730_p1 }
  0x2c   :  { %740 = shalt.err (!%p737_p5)
}
  0x2d   :  { %58 = dma.hbm_to_vmem [thread:$0]  %s902_s3, 2048, %s53_s6, [#allocation9], %s770_s18, %s770_s18, %s771_s19  }
  0x2e   :  { %761 = dma.done.wait [#allocation3], 128  }
  0x2f   :  { %762 = vsyncadd [#allocation3], 4294967168 }
  0x30   :  { %763 = dma.done.wait [#allocation6], 6144  }
  0x31   :  { %764 = vsyncadd [#allocation6], 4294961152 }
  0x32   :  { %765 = dma.done.wait [#allocation9], 2048  }
  0x33   :  { %766 = vsyncadd [#allocation9], 4294965248  ;;  %v775_v0 = vmov 0.0   ;;  %vm776_vm0 = vmmov 0   ;;  %v87_v1 = vld [vmem:[#allocation5 + $0x78] sm:$0xff]  ;;  %v86_v2 = vld [vmem:[#allocation5 + $0x70] sm:$0xff] }
  0x34   :  { %506 = vmatprep.subr.mxu0 %v775_v0  ;;  %538 = vmatprep.mubr.msk.f32.mxu0 %vm776_vm0, %v775_v0  ;;  %v85_v3 = vld [vmem:[#allocation5 + $0x68] sm:$0xff]  ;;  %v84_v4 = vld [vmem:[#allocation5 + $0x60] sm:$0xff]  ;;  %v174_v5 = vld [vmem:[#allocation7 + $0x78] sm:$0xff]  ;;  %s777_s2 = smov [#allocation10]  }
  0x35   :  { %541 = vmatprep.subr.mxu1 %v775_v0  ;;  %573 = vmatprep.mubr.msk.f32.mxu1 %vm776_vm0, %v775_v0  ;;  %v83_v6 = vld [vmem:[#allocation5 + $0x58] sm:$0xff]  ;;  %v173_v7 = vld [vmem:[#allocation7 + $0x70] sm:$0xff]  ;;  %v172_v8 = vld [vmem:[#allocation7 + $0x68] sm:$0xff]  ;;  %s427_s3 = sshll.u32 %s777_s2, 4  ;;  %s428_s3 = int_to_ptr.vmem [resolvable:$true] %s427_s3 }
  0x36   :  { %507 = vmatpush3.msra.mxu0 %v87_v1  ;;  %542 = vmatpush3.msra.mxu1 %v174_v5  ;;  %v82_v9 = vld [vmem:[#allocation5 + $0x50] sm:$0xff]  ;;  %v171_v10 = vld [vmem:[#allocation7 + $0x60] sm:$0xff]  ;;  %v81_v11 = vld [vmem:[#allocation5 + $0x48] sm:$0xff]  ;;  %s741_s9 = scalar_lea.vmem %s428_s3, 128  ;;  %p746_p7 = scmp.lt.s32.totalorder %s428_s3, %s428_s3 }
  0x37   :  { %508 = vmatprep.subr.mxu0 %v775_v0  ;;  %543 = vmatprep.subr.mxu1 %v775_v0  ;;  %v170_v12 = vld [vmem:[#allocation7 + $0x58] sm:$0xff]  ;;  %v80_v13 = vld [vmem:[#allocation5 + $0x40] sm:$0xff]  ;;  %v169_v14 = vld [vmem:[#allocation7 + $0x50] sm:$0xff]  ;;  %p742_p6 = scmp.ne.s32.totalorder %s428_s3, %s741_s9  ;;  %p747_p8 = scmp.lt.s32.totalorder %s741_s9, %s741_s9 }
  0x38   :  { %509 = vmatpush3.msra.mxu0 %v86_v2  ;;  %544 = vmatpush3.msra.mxu1 %v173_v7  ;;  %v79_v15 = vld [vmem:[#allocation5 + $0x38] sm:$0xff]  ;;  %v168_v16 = vld [vmem:[#allocation7 + $0x48] sm:$0xff]  ;;  %v78_v17 = vld [vmem:[#allocation5 + $0x30] sm:$0xff] }
  0x39   :  { %510 = vmatprep.subr.mxu0 %v775_v0  ;;  %545 = vmatprep.subr.mxu1 %v775_v0  ;;  %v167_v18 = vld [vmem:[#allocation7 + $0x40] sm:$0xff]  ;;  %v77_v19 = vld [vmem:[#allocation5 + $0x28] sm:$0xff]  ;;  %v75_v21 = vld [vmem:[#allocation5 + $0x18] sm:$0xff]  ;;  %p748_p9 = por %p747_p8, %p746_p7 }
  0x3a   :  { %511 = vmatpush3.msra.mxu0 %v85_v3  ;;  %546 = vmatpush3.msra.mxu1 %v172_v8  ;;  %v76_v20 = vld [vmem:[#allocation5 + $0x20] sm:$0xff]  ;;  %v74_v22 = vld [vmem:[#allocation5 + $0x10] sm:$0xff]  ;;  %v73_v23 = vld [vmem:[#allocation5 + $0x8] sm:$0xff] }
  0x3b   :  { %512 = vmatprep.subr.mxu0 %v775_v0  ;;  %547 = vmatprep.subr.mxu1 %v775_v0  ;;  %v72_v24 = vld [vmem:[#allocation5] sm:$0xff]  ;;  %v71_v25 = vld [vmem:[#allocation2] sm:$0xff]  ;;  %v165_v27 = vld [vmem:[#allocation7 + $0x30] sm:$0xff]  ;;  %p749_p10 = pnand %p748_p9, %p742_p6 }
  0x3c   :  { %513 = vmatpush3.msra.mxu0 %v84_v4  ;;  %548 = vmatpush3.msra.mxu1 %v171_v10  ;;  %v166_v26 = vld [vmem:[#allocation7 + $0x38] sm:$0xff]  ;;  %v164_v28 = vld [vmem:[#allocation7 + $0x28] sm:$0xff]  ;;  %v163_v29 = vld [vmem:[#allocation7 + $0x20] sm:$0xff] }
  0x3d   :  { %514 = vmatprep.subr.mxu0 %v775_v0  ;;  %549 = vmatprep.subr.mxu1 %v775_v0  ;;  %v162_v30 = vld [vmem:[#allocation7 + $0x18] sm:$0xff]  ;;  %v161_v31 = vld [vmem:[#allocation7 + $0x10] sm:$0xff]  ;;  %v160_v32 = vld [vmem:[#allocation7 + $0x8] sm:$0xff] }
  0x3e   :  { %515 = vmatpush3.msra.mxu0 %v83_v6  ;;  %550 = vmatpush3.msra.mxu1 %v170_v12  ;;  %v159_v33 = vld [vmem:[#allocation7] sm:$0xff]  ;;  %v262_v34 = vld [vmem:[#allocation7 + $0xf8] sm:$0xff]  ;;  %v261_v35 = vld [vmem:[#allocation7 + $0xf0] sm:$0xff] }
  0x3f   :  { %516 = vmatprep.subr.mxu0 %v775_v0  ;;  %551 = vmatprep.subr.mxu1 %v775_v0  ;;  %v260_v36 = vld [vmem:[#allocation7 + $0xe8] sm:$0xff]  ;;  %v259_v37 = vld [vmem:[#allocation7 + $0xe0] sm:$0xff]  ;;  %v258_v38 = vld [vmem:[#allocation7 + $0xd8] sm:$0xff] }
  0x40   :  { %517 = vmatpush3.msra.mxu0 %v82_v9  ;;  %552 = vmatpush3.msra.mxu1 %v169_v14  ;;  %v257_v39 = vld [vmem:[#allocation7 + $0xd0] sm:$0xff]  ;;  %v256_v40 = vld [vmem:[#allocation7 + $0xc8] sm:$0xff]  ;;  %v255_v41 = vld [vmem:[#allocation7 + $0xc0] sm:$0xff] }
  0x41   :  { %518 = vmatprep.subr.mxu0 %v775_v0  ;;  %553 = vmatprep.subr.mxu1 %v775_v0  ;;  %v254_v45 = vld [vmem:[#allocation7 + $0xb8] sm:$0xff]  ;;  %v253_v46 = vld [vmem:[#allocation7 + $0xb0] sm:$0xff]  ;;  %v252_v47 = vld [vmem:[#allocation7 + $0xa8] sm:$0xff] }
  0x42   :  { %519 = vmatpush3.msra.mxu0 %v81_v11  ;;  %554 = vmatpush3.msra.mxu1 %v168_v16  ;;  %v251_v48 = vld [vmem:[#allocation7 + $0xa0] sm:$0xff]  ;;  %v250_v49 = vld [vmem:[#allocation7 + $0x98] sm:$0xff]  ;;  %v249_v50 = vld [vmem:[#allocation7 + $0x90] sm:$0xff] }
  0x43   :  { %520 = vmatprep.subr.mxu0 %v775_v0  ;;  %555 = vmatprep.subr.mxu1 %v775_v0  ;;  %v248_v51 = vld [vmem:[#allocation7 + $0x88] sm:$0xff]  ;;  %v247_v52 = vld [vmem:[#allocation7 + $0x80] sm:$0xff]  ;;  %v349_v53 = vld [vmem:[#allocation8 + $0x78] sm:$0xff] }
  0x44   :  { %521 = vmatpush3.msra.mxu0 %v80_v13  ;;  %556 = vmatpush3.msra.mxu1 %v167_v18  ;;  %v348_v54 = vld [vmem:[#allocation8 + $0x70] sm:$0xff]  ;;  %v347_v55 = vld [vmem:[#allocation8 + $0x68] sm:$0xff]  ;;  %v346_v56 = vld [vmem:[#allocation8 + $0x60] sm:$0xff] }
  0x45   :  { %522 = vmatprep.subr.mxu0 %v775_v0  ;;  %557 = vmatprep.subr.mxu1 %v775_v0  ;;  %v345_v57 = vld [vmem:[#allocation8 + $0x58] sm:$0xff]  ;;  %v344_v58 = vld [vmem:[#allocation8 + $0x50] sm:$0xff]  ;;  %v343_v59 = vld [vmem:[#allocation8 + $0x48] sm:$0xff] }
  0x46   :  { %523 = vmatpush3.msra.mxu0 %v79_v15  ;;  %558 = vmatpush3.msra.mxu1 %v166_v26  ;;  %v342_v60 = vld [vmem:[#allocation8 + $0x40] sm:$0xff]  ;;  %v341_v1 = vld [vmem:[#allocation8 + $0x38] sm:$0xff]  ;;  %v340_v2 = vld [vmem:[#allocation8 + $0x30] sm:$0xff] }
  0x47   :  { %524 = vmatprep.subr.mxu0 %v775_v0  ;;  %559 = vmatprep.subr.mxu1 %v775_v0  ;;  %v339_v3 = vld [vmem:[#allocation8 + $0x28] sm:$0xff]  ;;  %v338_v4 = vld [vmem:[#allocation8 + $0x20] sm:$0xff]  ;;  %v337_v5 = vld [vmem:[#allocation8 + $0x18] sm:$0xff] }
  0x48   :  { %525 = vmatpush3.msra.mxu0 %v78_v17  ;;  %560 = vmatpush3.msra.mxu1 %v165_v27  ;;  %v336_v6 = vld [vmem:[#allocation8 + $0x10] sm:$0xff]  ;;  %v335_v7 = vld [vmem:[#allocation8 + $0x8] sm:$0xff]  ;;  %v334_v8 = vld [vmem:[#allocation8] sm:$0xff] }
  0x49   :  { %526 = vmatprep.subr.mxu0 %v775_v0  ;;  %561 = vmatprep.subr.mxu1 %v775_v0 }
  0x4a   :  { %527 = vmatpush3.msra.mxu0 %v77_v19  ;;  %562 = vmatpush3.msra.mxu1 %v164_v28 }
  0x4b   :  { %528 = vmatprep.subr.mxu0 %v775_v0  ;;  %563 = vmatprep.subr.mxu1 %v775_v0 }
  0x4c   :  { %529 = vmatpush3.msra.mxu0 %v76_v20  ;;  %564 = vmatpush3.msra.mxu1 %v163_v29 }
  0x4d   :  { %530 = vmatprep.subr.mxu0 %v775_v0  ;;  %565 = vmatprep.subr.mxu1 %v775_v0 }
  0x4e   :  { %531 = vmatpush3.msra.mxu0 %v75_v21  ;;  %566 = vmatpush3.msra.mxu1 %v162_v30 }
  0x4f   :  { %532 = vmatprep.subr.mxu0 %v775_v0  ;;  %567 = vmatprep.subr.mxu1 %v775_v0 }
  0x50   :  { %533 = vmatpush3.msra.mxu0 %v74_v22  ;;  %568 = vmatpush3.msra.mxu1 %v161_v31 }
  0x51   :  { %534 = vmatprep.subr.mxu0 %v775_v0  ;;  %569 = vmatprep.subr.mxu1 %v775_v0 }
  0x52   :  { %535 = vmatpush3.msra.mxu0 %v73_v23  ;;  %570 = vmatpush3.msra.mxu1 %v160_v32 }
  0x53   :  { %536 = vmatprep.subr.mxu0 %v775_v0  ;;  %571 = vmatprep.subr.mxu1 %v775_v0 }
  0x54   :  { %537 = vmatpush3.msra.mxu0 %v72_v24  ;;  %572 = vmatpush3.msra.mxu1 %v159_v33 }
  0x55   :  { %539 = vmatmul.mubr.f32.vlgmr.msra.gmra.mxu0 %v71_v25  ;;  %576 = vmatprep.subr.mxu0 %v775_v0 }
  0x56   :  { %608 = vmatprep.mubr.msk.f32.mxu0 %vm776_vm0, %v775_v0  ;;  %611 = vmatprep.subr.mxu1 %v775_v0 }
  0x57   :  { %577 = vmatpush3.msra.mxu0 %v262_v34 }
  0x58   :  { %578 = vmatprep.subr.mxu0 %v775_v0 }
  0x59   :  { %579 = vmatpush3.msra.mxu0 %v261_v35 }
  0x5a   :  { %580 = vmatprep.subr.mxu0 %v775_v0 }
  0x5b   :  { %581 = vmatpush3.msra.mxu0 %v260_v36 }
  0x5c   :  { %582 = vmatprep.subr.mxu0 %v775_v0 }
  0x5d   :  { %583 = vmatpush3.msra.mxu0 %v259_v37 }
  0x5e   :  { %584 = vmatprep.subr.mxu0 %v775_v0 }
  0x5f   :  { %585 = vmatpush3.msra.mxu0 %v258_v38 }
  0x60   :  { %586 = vmatprep.subr.mxu0 %v775_v0 }
  0x61   :  { %587 = vmatpush3.msra.mxu0 %v257_v39 }
  0x62   :  { %588 = vmatprep.subr.mxu0 %v775_v0 }
  0x63   :  { %589 = vmatpush3.msra.mxu0 %v256_v40 }
  0x64   :  { %590 = vmatprep.subr.mxu0 %v775_v0 }
  0x65   :  { %591 = vmatpush3.msra.mxu0 %v255_v41 }
  0x66   :  { %592 = vmatprep.subr.mxu0 %v775_v0 }
  0x67   :  { %593 = vmatpush3.msra.mxu0 %v254_v45 }
  0x68   :  { %594 = vmatprep.subr.mxu0 %v775_v0 }
  0x69   :  { %595 = vmatpush3.msra.mxu0 %v253_v46 }
  0x6a   :  { %596 = vmatprep.subr.mxu0 %v775_v0 }
  0x6b   :  { %597 = vmatpush3.msra.mxu0 %v252_v47 }
  0x6c   :  { %598 = vmatprep.subr.mxu0 %v775_v0 }
  0x6d   :  { %599 = vmatpush3.msra.mxu0 %v251_v48 }
  0x6e   :  { %600 = vmatprep.subr.mxu0 %v775_v0 }
  0x6f   :  { %601 = vmatpush3.msra.mxu0 %v250_v49 }
  0x70   :  { %602 = vmatprep.subr.mxu0 %v775_v0 }
  0x71   :  { %603 = vmatpush3.msra.mxu0 %v249_v50 }
  0x72   :  { %604 = vmatprep.subr.mxu0 %v775_v0 }
  0x73   :  { %605 = vmatpush3.msra.mxu0 %v248_v51 }
  0x74   :  { %606 = vmatprep.subr.mxu0 %v775_v0 }
  0x75   :  { %607 = vmatpush3.msra.mxu0 %v247_v52 }
 0x115   :  { %v154_v42 = vpop.f32.mrf.mxu0 }
 0x116   :  { %655 = vtanh.f32 %v154_v42 }
 0x117   :  { %v540_v43 = vpop.f32.mrf.mxu0 }
 0x123   :  { %v656_v44 = vpop.eup %655 }
 0x124   :  { %574 = vmatmul.mubr.f32.vlgmr.msra.gmra.mxu1 %v656_v44 }
 0x125   :  { %643 = vmatprep.mubr.msk.f32.mxu1 %vm776_vm0, %v775_v0  ;;  %612 = vmatpush3.msra.mxu1 %v349_v53 }
 0x126   :  { %613 = vmatprep.subr.mxu1 %v775_v0 }
 0x127   :  { %614 = vmatpush3.msra.mxu1 %v348_v54 }
 0x128   :  { %615 = vmatprep.subr.mxu1 %v775_v0 }
 0x129   :  { %616 = vmatpush3.msra.mxu1 %v347_v55 }
 0x12a   :  { %617 = vmatprep.subr.mxu1 %v775_v0 }
 0x12b   :  { %618 = vmatpush3.msra.mxu1 %v346_v56 }
 0x12c   :  { %619 = vmatprep.subr.mxu1 %v775_v0 }
 0x12d   :  { %620 = vmatpush3.msra.mxu1 %v345_v57 }
 0x12e   :  { %621 = vmatprep.subr.mxu1 %v775_v0 }
 0x12f   :  { %622 = vmatpush3.msra.mxu1 %v344_v58 }
 0x130   :  { %623 = vmatprep.subr.mxu1 %v775_v0 }
 0x131   :  { %624 = vmatpush3.msra.mxu1 %v343_v59 }
 0x132   :  { %625 = vmatprep.subr.mxu1 %v775_v0 }
 0x133   :  { %626 = vmatpush3.msra.mxu1 %v342_v60 }
 0x134   :  { %627 = vmatprep.subr.mxu1 %v775_v0 }
 0x135   :  { %628 = vmatpush3.msra.mxu1 %v341_v1 }
 0x136   :  { %629 = vmatprep.subr.mxu1 %v775_v0 }
 0x137   :  { %630 = vmatpush3.msra.mxu1 %v340_v2 }
 0x138   :  { %631 = vmatprep.subr.mxu1 %v775_v0 }
 0x139   :  { %632 = vmatpush3.msra.mxu1 %v339_v3 }
 0x13a   :  { %633 = vmatprep.subr.mxu1 %v775_v0 }
 0x13b   :  { %634 = vmatpush3.msra.mxu1 %v338_v4 }
 0x13c   :  { %635 = vmatprep.subr.mxu1 %v775_v0 }
 0x13d   :  { %636 = vmatpush3.msra.mxu1 %v337_v5 }
 0x13e   :  { %637 = vmatprep.subr.mxu1 %v775_v0 }
 0x13f   :  { %638 = vmatpush3.msra.mxu1 %v336_v6 }
 0x140   :  { %639 = vmatprep.subr.mxu1 %v775_v0 }
 0x141   :  { %640 = vmatpush3.msra.mxu1 %v335_v7 }
 0x142   :  { %641 = vmatprep.subr.mxu1 %v775_v0 }
 0x143   :  { %642 = vmatpush3.msra.mxu1 %v334_v8 }
 0x1e4   :  { %v241_v61 = vpop.f32.mrf.mxu1 }
 0x1e5   :  { %657 = vtanh.f32 %v241_v61 }
 0x1e6   :  { %v575_v62 = vpop.f32.mrf.mxu1 }
 0x1f2   :  { %v658_v63 = vpop.eup %657 }
 0x1f3   :  { %609 = vmatmul.mubr.f32.vlgmr.msra.gmra.mxu0 %v658_v63 }
 0x2b3   :  { %v329_v9 = vpop.f32.mrf.mxu0 }
 0x2b4   :  { %659 = vtanh.f32 %v329_v9 }
 0x2b5   :  { %v610_v10 = vpop.f32.mrf.mxu0 }
 0x2c1   :  { %v660_v11 = vpop.eup %659 }
 0x2c2   :  { %644 = vmatmul.mubr.f32.vlgmr.msra.gmra.mxu1 %v660_v11 }
 0x382   :  { %v416_v12 = vpop.f32.mrf.mxu1 }
 0x383   :  { %420 = vst [vmem:[#allocation10] sm:$0xff] %v416_v12 }
 0x384   :  { %v645_v13 = vpop.f32.mrf.mxu1 }
 0x385   :  { %752 = shalt.err (!%p749_p10)
}
 0x386   :  { %430 = dma.vmem_to_hbm [thread:$0]  %s428_s3, 128, %s903_s4, [#allocation4]  }
 0x387   :  { %767 = dma.done.wait [#allocation4], 128  }
 0x388   :  { %768 = vsyncadd [#allocation4], 4294967168 }
 0x389   :  { %434 = vsyncpa [#allocation3], 1 }
 0x38a   :  { %435 = vsyncpa [#allocation6], 1 }
 0x38b   :  { %436 = vsyncpa [#allocation9], 1 }
 0x38c   :  { %437 = vsyncpa [#allocation4], 1 }

</bundles_post_ra>
